<compile_context>
chip_gen: v6e
topology: v6e:2x2x1
jax: 0.10.0
libtpu: 0.0.40
codegen_flags: <defaults>
</compile_context>

<pallas_src>
import jax
import jax.numpy as jnp
from jax.experimental import pallas as pl
from jax.experimental.pallas import tpu as pltpu


def _identity_copy_kernel(x_hbm_ref, o_hbm_ref, sem):
    # forward(x) = x : one whole-array HBM -> HBM DMA, nothing else.
    cp = pltpu.make_async_copy(x_hbm_ref, o_hbm_ref, sem)
    cp.start()
    cp.wait()


def _identity_copy(x: jax.Array) -> jax.Array:
    nbytes = x.size * jnp.dtype(x.dtype).itemsize
    return pl.pallas_call(
        _identity_copy_kernel,
        out_shape=jax.ShapeDtypeStruct(x.shape, x.dtype),
        in_specs=[pl.BlockSpec(memory_space=pl.ANY)],   # raw HBM ref (no auto-DMA)
        out_specs=pl.BlockSpec(memory_space=pl.ANY),    # raw HBM ref; we DMA into it
        scratch_shapes=[pltpu.SemaphoreType.DMA(())],
        # Pure memory traffic: 1x read + 1x write of the array.
        cost_estimate=pl.CostEstimate(
            flops=0, transcendentals=0, bytes_accessed=2 * nbytes
        ),
    )(x)


@jax.jit
def network_base_forward(x: jax.Array) -> jax.Array:
    """NetworkBase.forward(x) == x, routed through a single Pallas HBM->HBM DMA."""
    # NOTE: the truly fastest identity moves zero bytes (return x); the kernel is
    # kept so the data genuinely flows through a Pallas call. Only the degenerate
    # empty case short-circuits.
    if x.size == 0:
        return x
    return _identity_copy(x)


if __name__ == "__main__":
    # NetworkBase is abstract (no parameters declared in __init__), so there are
    # no weights to initialize — forward is exactly the identity.
    # TODO(synk): subclasses of NetworkBase define real layers; only the base
    # class's identity forward is implemented here.
    key = jax.random.PRNGKey(0)

    # Primary test: small NCHW tensor (batch=2, channels=4, spatial=16x16).
    x = jax.random.normal(key, (2, 4, 16, 16), dtype=jnp.float32)
    y = jax.block_until_ready(network_base_forward(x))
    assert y.shape == x.shape and y.dtype == x.dtype
    assert bool(jnp.all(y == x))

    # Secondary test: ragged (non-128-divisible) shape — no pad/slice path needed.
    x2 = jax.random.normal(jax.random.PRNGKey(1), (3, 5, 7), dtype=jnp.bfloat16)
    y2 = jax.block_until_ready(network_base_forward(x2))
    assert y2.shape == x2.shape and y2.dtype == x2.dtype
    assert bool(jnp.all(y2 == x2))

    print("KERNEL_OK")
</pallas_src>

<mosaic_0001>
module attributes {stable_mosaic.version = 11 : i64} {
  func.func @_identity_copy_kernel(%arg0: memref<2x4x16x16xf32, #tpu.memory_space<any>>, %arg1: memref<2x4x16x16xf32, #tpu.memory_space<any>>, %arg2: memref<!tpu.dma_semaphore, #tpu.memory_space<semaphore_mem>>) attributes {dimension_semantics = [], scalar_prefetch = 0 : i64, scratch_operands = 1 : i64, tpu.core_type = #tpu.core_type<tc>} {
    tpu.enqueue_dma source(%arg0 : memref<2x4x16x16xf32, #tpu.memory_space<any>>) target(%arg1 : memref<2x4x16x16xf32, #tpu.memory_space<any>>) target_semaphore(%arg2 : memref<!tpu.dma_semaphore, #tpu.memory_space<semaphore_mem>>)
    tpu.wait_dma2 semaphore(%arg2 : memref<!tpu.dma_semaphore, #tpu.memory_space<semaphore_mem>>) src(%arg0 : memref<2x4x16x16xf32, #tpu.memory_space<any>>) dst(%arg1 : memref<2x4x16x16xf32, #tpu.memory_space<any>>)
    return
  }
}

</mosaic_0001>

<bundles_post_ra>
// kernel: network_base_forward.1
= control target key start
LH: loop header
LB: loop body
LE: loop exit
PB: predicated region body
PF: predicated region fallthrough
CT: control target
= control target key end

     0   :  { %s30_s6 = smov [#allocation2]   ;;  %s31_s7 = smov 131072   ;;  %s49_s0 = inlined_call_operand.hbm [shape: f32[2,4,16,16], index: 0, kind: input, shape index: {}]   ;;  %s50_s1 = inlined_call_operand.hbm [shape: f32[2,4,16,16], index: 1, kind: output, shape index: {}]  }
   0x1   :  { %s32_s8 = smov 0  }
   0x2   :  { %12 = dma.general %s49_s0, 2048, %s50_s1, %s30_s6, %s31_s7, [#allocation4], %s32_s8, 0  }
   0x3   :  { %28 = dma.done.wait [#allocation2], 2048 }
   0x4   :  { %29 = vsyncadd [#allocation2], 4294965248 }
   0x5   :  { %18 = vsyncmov [#allocation2] }
   0x8   :  { %s19_s13 = vpop.sfrf %18 }
   0x9   :  { %p24_p0 = scmp.ne.s32.totalorder %s19_s13, 0 }
   0xb   :  { %23 = shalt.err (%p24_p0)  }

</bundles_post_ra>
